<compile_context>
chip_gen: v5e
topology: v5e:2x2
jax: 0.10.0
libtpu: 0.0.40
codegen_flags: <defaults>
</compile_context>

<pallas_src>
import functools

import jax
import jax.numpy as jnp
from jax.experimental import pallas as pl
from jax.experimental.pallas import tpu as pltpu


def _round_up(x, m):
    return ((x + m - 1) // m) * m


def _cdiv(a, b):
    return -(-a // b)


def _pick_tile(bsz, itemsize, d, target_block_bytes):
    """Lane-tile sized so one (B, tile) block is ~target_block_bytes."""
    lanes = max(128, target_block_bytes // max(1, bsz * itemsize))
    lanes = (lanes // 128) * 128
    return int(min(lanes, _round_up(d, 128)))


def _gram_kernel(x1_ref, x2_ref, g1_ref, g2_ref, g1_acc, g2_acc, *,
                 nks, nk1, nk2, d1, d2, t1, t2):
    # x1_ref: (B, t1) tile of input1 (native dtype); x2_ref: (B, t2) of input2.
    # g1_ref/g2_ref: (B, B) f32 partial-Gram output blocks (one per split p).
    # g1_acc/g2_acc: (B, B) f32 VMEM scratch accumulators.
    p = pl.program_id(0)          # feature-range split (parallel; v7x megacore)
    k = pl.program_id(1)          # feature step within the split (arbitrary)
    gk = p * nks + k              # global feature-tile index

    @pl.when(k == 0)
    def _():
        g1_acc[...] = jnp.zeros_like(g1_acc)
        g2_acc[...] = jnp.zeros_like(g2_acc)

    @pl.when(gk < nk1)
    def _():
        a = x1_ref[...]
        if d1 % t1 != 0:
            # Ragged last block: mask unspecified out-of-bounds lanes.
            lane = jax.lax.broadcasted_iota(jnp.int32, a.shape, 1)
            a = jnp.where(lane < (d1 - gk * t1), a, jnp.zeros_like(a))
        # (B, B) Gram: contract over the lane/feature axis -> deep MXU K,
        # no (B, D) operand transpose of the batch-contraction form.  Kernel
        # stays DMA-bound; the tiny (B, B) matmul output is negligible.
        g1_acc[...] += jax.lax.dot_general(
            a, a, dimension_numbers=(((1,), (1,)), ((), ())),
            preferred_element_type=jnp.float32)

    @pl.when(gk < nk2)
    def _():
        b = x2_ref[...]
        if d2 % t2 != 0:
            lane = jax.lax.broadcasted_iota(jnp.int32, b.shape, 1)
            b = jnp.where(lane < (d2 - gk * t2), b, jnp.zeros_like(b))
        g2_acc[...] += jax.lax.dot_general(
            b, b, dimension_numbers=(((1,), (1,)), ((), ())),
            preferred_element_type=jnp.float32)

    @pl.when(k == nks - 1)
    def _():
        g1_ref[...] = g1_acc[...]
        g2_ref[...] = g2_acc[...]


def _finalize_gram(g, bsz):
    """Fold centering + row-norm scaling into the raw Gram (O(B^2), plain JAX).

    Ac Ac^T = G - r 1^T - 1 r^T + t,  r = G @ 1 / B,  t = sum(G) / B^2
    (G is symmetric, so row sums == column sums.)  Row L2 norms are
    sqrt(diag(centered Gram)); the 1/(norm + 1e-6) scales are an outer product.
    """
    inv_b = 1.0 / bsz
    r = jnp.sum(g, axis=1, keepdims=True) * inv_b        # (B, 1)
    t = jnp.sum(r) * inv_b
    gc = g - r - r.T + t
    diag = jnp.diagonal(gc)[:, None]                      # (B, 1)
    s = 1.0 / (jnp.sqrt(jnp.maximum(diag, 0.0)) + 1e-6)
    return gc * (s * s.T)


def diff_loss(x1, x2, *, tile_d=None, target_block_bytes=2 << 20):
    """Pallas implementation of MISA DiffLoss.forward(input1, input2)."""
    bsz = x1.shape[0]
    a = jnp.reshape(x1, (bsz, -1))   # stream native dtype; MXU accumulates f32
    b = jnp.reshape(x2, (bsz, -1))
    d1, d2 = a.shape[1], b.shape[1]

    # Per-input lane tiles (no padding, no shared padded width).
    if tile_d is None:
        t1 = _pick_tile(bsz, a.dtype.itemsize, d1, target_block_bytes)
        t2 = _pick_tile(bsz, b.dtype.itemsize, d2, target_block_bytes)
    else:
        td = _round_up(int(tile_d), 128)
        t1 = min(td, _round_up(d1, 128))
        t2 = min(td, _round_up(d2, 128))

    nk1 = _cdiv(d1, t1)
    nk2 = _cdiv(d2, t2)
    nk_max = max(nk1, nk2)
    num_splits = 2 if nk_max >= 2 else 1     # 2-way split feeds both v7x TCs
    nks = _cdiv(nk_max, num_splits)

    kernel = functools.partial(
        _gram_kernel, nks=nks, nk1=nk1, nk2=nk2, d1=d1, d2=d2, t1=t1, t2=t2)

    # Double-buffered input blocks + tiny scratch/outputs; explicit VMEM limit
    # stays within v7x's 64 MiB physical / v5e's conservative scoped default.
    in_block_bytes = 2 * (bsz * t1 * a.dtype.itemsize
                          + bsz * t2 * b.dtype.itemsize)
    vmem_limit = int(min(48 << 20, max(16 << 20, in_block_bytes + (8 << 20))))

    g1_parts, g2_parts = pl.pallas_call(
        kernel,
        out_shape=(
            jax.ShapeDtypeStruct((num_splits, bsz, bsz), jnp.float32),
            jax.ShapeDtypeStruct((num_splits, bsz, bsz), jnp.float32),
        ),
        grid_spec=pltpu.PrefetchScalarGridSpec(
            num_scalar_prefetch=0,
            grid=(num_splits, nks),
            in_specs=[
                # Clamp the block index so steps past an input's own range
                # re-use the last valid block (no re-fetch, no OOB DMA); the
                # compute for those steps is skipped via pl.when in the kernel.
                pl.BlockSpec(
                    (bsz, t1),
                    lambda p, k: (0, jnp.minimum(p * nks + k, nk1 - 1))),
                pl.BlockSpec(
                    (bsz, t2),
                    lambda p, k: (0, jnp.minimum(p * nks + k, nk2 - 1))),
            ],
            out_specs=[
                pl.BlockSpec((None, bsz, bsz), lambda p, k: (p, 0, 0)),
                pl.BlockSpec((None, bsz, bsz), lambda p, k: (p, 0, 0)),
            ],
            scratch_shapes=[
                pltpu.VMEM((bsz, bsz), jnp.float32),
                pltpu.VMEM((bsz, bsz), jnp.float32),
            ],
        ),
        compiler_params=pltpu.CompilerParams(
            dimension_semantics=("parallel", "arbitrary"),
            vmem_limit_bytes=vmem_limit),
    )(a, b)

    # Combine the per-split partial Grams and finalize (tiny O(B^2) work).
    g1 = jnp.sum(g1_parts, axis=0)
    g2 = jnp.sum(g2_parts, axis=0)
    n1 = _finalize_gram(g1, bsz)
    n2 = _finalize_gram(g2, bsz)
    # sum(M^2) = sum( (A_l2 A_l2^T) * (B_l2 B_l2^T) ); mean over true D1*D2.
    return jnp.sum(n1 * n2) / jnp.float32(d1 * d2)


def _diff_loss_ref(x1, x2):
    """Pure-JAX reference mirroring the PyTorch forward."""
    bsz = x1.shape[0]
    a = jnp.reshape(x1, (bsz, -1)).astype(jnp.float32)
    b = jnp.reshape(x2, (bsz, -1)).astype(jnp.float32)
    a = a - jnp.mean(a, axis=0, keepdims=True)
    b = b - jnp.mean(b, axis=0, keepdims=True)
    a = a / (jnp.linalg.norm(a, axis=1, keepdims=True) + 1e-6)
    b = b / (jnp.linalg.norm(b, axis=1, keepdims=True) + 1e-6)
    m = a.T @ b
    return jnp.mean(m ** 2)


if __name__ == "__main__":
    key = jax.random.PRNGKey(0)
    k1, k2, k3 = jax.random.split(key, 3)

    # DiffLoss has no parameters; inputs are two feature tensors flattened to
    # (batch, -1).  x2's width (240) is not a multiple of 128, exercising the
    # ragged-last-block masking path; the forced tile_d=128 run exercises the
    # multi-step accumulation, per-input guards and the 2-way parallel split.
    x1 = jax.random.normal(k1, (8, 4, 4, 8), dtype=jnp.float32)   # -> (8, 128)
    x2 = jax.random.normal(k2, (8, 8, 30), dtype=jnp.float32)     # -> (8, 240)
    x3 = jax.random.normal(k3, (8, 3, 200), dtype=jnp.float32)    # -> (8, 600)

    ref_12 = _diff_loss_ref(x1, x2)
    ref_32 = _diff_loss_ref(x3, x2)

    out_auto = jax.block_until_ready(diff_loss(x1, x2))               # auto tile
    out_tiled = jax.block_until_ready(diff_loss(x1, x2, tile_d=128))  # multi-step
    out_big = jax.block_until_ready(diff_loss(x3, x2, tile_d=128))    # 2-way split

    for out, ref in ((out_auto, ref_12), (out_tiled, ref_12), (out_big, ref_32)):
        assert jnp.isfinite(out), "non-finite kernel output"
        assert jnp.allclose(out, ref, rtol=2e-3, atol=1e-7), (out, ref)

    print("KERNEL_OK")
</pallas_src>

<mosaic_0001>
module attributes {stable_mosaic.version = 11 : i64} {
  func.func @_gram_kernel(%arg0: i32, %arg1: i32, %arg2: memref<8x128xf32, #tpu.memory_space<vmem>>, %arg3: memref<8x256xf32, #tpu.memory_space<vmem>>, %arg4: memref<1x8x8xf32, #tpu.memory_space<vmem>>, %arg5: memref<1x8x8xf32, #tpu.memory_space<vmem>>, %arg6: memref<8x8xf32, #tpu.memory_space<vmem>>, %arg7: memref<8x8xf32, #tpu.memory_space<vmem>>) attributes {dimension_semantics = [#tpu.dimension_semantics<parallel>, #tpu.dimension_semantics<arbitrary>], iteration_bounds = array<i64: 1, 1>, scalar_prefetch = 0 : i64, scratch_operands = 2 : i64, tpu.core_type = #tpu.core_type<tc>, window_params = [{transform_indices = @transform_0, window_bounds = array<i64: 8, 128>}, {transform_indices = @transform_1, window_bounds = array<i64: 8, 256>}, {transform_indices = @transform_2, window_bounds = array<i64: 1, 8, 8>}, {transform_indices = @transform_3, window_bounds = array<i64: 1, 8, 8>}]} {
    %c1_i32 = arith.constant 1 : i32
    %0 = arith.muli %arg0, %c1_i32 : i32
    %1 = arith.addi %0, %arg1 : i32
    %c0_i32 = arith.constant 0 : i32
    %2 = arith.cmpi eq, %arg1, %c0_i32 : i32
    %3 = arith.extui %2 : i1 to i32
    %c0_i32_0 = arith.constant 0 : i32
    %4 = arith.cmpi ne, %3, %c0_i32_0 : i32
    scf.if %4 {
      %cst = arith.constant 0.000000e+00 : f32
      %14 = vector.broadcast %cst : f32 to vector<8x8xf32>
      %c0 = arith.constant 0 : index
      %c0_7 = arith.constant 0 : index
      %15 = vector.load %arg6[%c0, %c0_7] : memref<8x8xf32, #tpu.memory_space<vmem>>, vector<8x8xf32>
      tpu.vector_store %arg6[%c0, %c0_7], %14 {strides = array<i32>} : memref<8x8xf32, #tpu.memory_space<vmem>>, vector<8x8xf32>,
      %cst_8 = arith.constant 0.000000e+00 : f32
      %16 = vector.broadcast %cst_8 : f32 to vector<8x8xf32>
      %c0_9 = arith.constant 0 : index
      %c0_10 = arith.constant 0 : index
      %17 = vector.load %arg7[%c0_9, %c0_10] : memref<8x8xf32, #tpu.memory_space<vmem>>, vector<8x8xf32>
      tpu.vector_store %arg7[%c0_9, %c0_10], %16 {strides = array<i32>} : memref<8x8xf32, #tpu.memory_space<vmem>>, vector<8x8xf32>,
    } else {
    }
    %c1_i32_1 = arith.constant 1 : i32
    %5 = arith.cmpi slt, %1, %c1_i32_1 : i32
    %6 = arith.extui %5 : i1 to i32
    %c0_i32_2 = arith.constant 0 : i32
    %7 = arith.cmpi ne, %6, %c0_i32_2 : i32
    scf.if %7 {
      %c0 = arith.constant 0 : index
      %c0_7 = arith.constant 0 : index
      %14 = vector.load %arg2[%c0, %c0_7] : memref<8x128xf32, #tpu.memory_space<vmem>>, vector<8x128xf32>
      %c0_8 = arith.constant 0 : index
      %c0_9 = arith.constant 0 : index
      %15 = vector.load %arg6[%c0_8, %c0_9] : memref<8x8xf32, #tpu.memory_space<vmem>>, vector<8x8xf32>
      %cst = arith.constant dense<0.000000e+00> : vector<8x8xf32>
      %16 = tpu.matmul %14, %14, %cst {dimension_numbers = #tpu.dot_dimension_numbers<[1], [1], [0], [0], [0, 0, 1, 0], [], []>} : vector<8x128xf32>, vector<8x128xf32>, vector<8x8xf32> -> vector<8x8xf32>
      %17 = arith.addf %15, %16 : vector<8x8xf32>
      %c0_10 = arith.constant 0 : index
      %c0_11 = arith.constant 0 : index
      %18 = vector.load %arg6[%c0_10, %c0_11] : memref<8x8xf32, #tpu.memory_space<vmem>>, vector<8x8xf32>
      tpu.vector_store %arg6[%c0_10, %c0_11], %17 {strides = array<i32>} : memref<8x8xf32, #tpu.memory_space<vmem>>, vector<8x8xf32>,
    } else {
    }
    %c1_i32_3 = arith.constant 1 : i32
    %8 = arith.cmpi slt, %1, %c1_i32_3 : i32
    %9 = arith.extui %8 : i1 to i32
    %c0_i32_4 = arith.constant 0 : i32
    %10 = arith.cmpi ne, %9, %c0_i32_4 : i32
    scf.if %10 {
      %c0 = arith.constant 0 : index
      %c0_7 = arith.constant 0 : index
      %14 = vector.load %arg3[%c0, %c0_7] : memref<8x256xf32, #tpu.memory_space<vmem>>, vector<8x256xf32>
      %15 = tpu.iota {dimensions = array<i32: 1>} : vector<8x256xi32>
      %c256_i32 = arith.constant 256 : i32
      %16 = arith.muli %1, %c256_i32 : i32
      %c240_i32 = arith.constant 240 : i32
      %17 = arith.subi %c240_i32, %16 : i32
      %18 = vector.broadcast %17 : i32 to vector<8x256xi32>
      %19 = arith.cmpi slt, %15, %18 : vector<8x256xi32>
      %cst = arith.constant 0.000000e+00 : f32
      %20 = vector.broadcast %cst : f32 to vector<8x256xf32>
      %21 = arith.select %19, %14, %20 : vector<8x256xi1>, vector<8x256xf32>
      %c0_8 = arith.constant 0 : index
      %c0_9 = arith.constant 0 : index
      %22 = vector.load %arg7[%c0_8, %c0_9] : memref<8x8xf32, #tpu.memory_space<vmem>>, vector<8x8xf32>
      %cst_10 = arith.constant dense<0.000000e+00> : vector<8x8xf32>
      %23 = tpu.matmul %21, %21, %cst_10 {dimension_numbers = #tpu.dot_dimension_numbers<[1], [1], [0], [0], [0, 0, 1, 0], [], []>} : vector<8x256xf32>, vector<8x256xf32>, vector<8x8xf32> -> vector<8x8xf32>
      %24 = arith.addf %22, %23 : vector<8x8xf32>
      %c0_11 = arith.constant 0 : index
      %c0_12 = arith.constant 0 : index
      %25 = vector.load %arg7[%c0_11, %c0_12] : memref<8x8xf32, #tpu.memory_space<vmem>>, vector<8x8xf32>
      tpu.vector_store %arg7[%c0_11, %c0_12], %24 {strides = array<i32>} : memref<8x8xf32, #tpu.memory_space<vmem>>, vector<8x8xf32>,
    } else {
    }
    %c0_i32_5 = arith.constant 0 : i32
    %11 = arith.cmpi eq, %arg1, %c0_i32_5 : i32
    %12 = arith.extui %11 : i1 to i32
    %c0_i32_6 = arith.constant 0 : i32
    %13 = arith.cmpi ne, %12, %c0_i32_6 : i32
    scf.if %13 {
      %c0 = arith.constant 0 : index
      %c0_7 = arith.constant 0 : index
      %14 = vector.load %arg6[%c0, %c0_7] : memref<8x8xf32, #tpu.memory_space<vmem>>, vector<8x8xf32>
      %c0_8 = arith.constant 0 : index
      %c0_9 = arith.constant 0 : index
      %c0_10 = arith.constant 0 : index
      %15 = vector.load %arg4[%c0_8, %c0_9, %c0_10] : memref<1x8x8xf32, #tpu.memory_space<vmem>>, vector<1x8x8xf32>
      %16 = vector.shape_cast %15 : vector<1x8x8xf32> to vector<8x8xf32>
      %17 = vector.shape_cast %14 : vector<8x8xf32> to vector<1x8x8xf32>
      tpu.vector_store %arg4[%c0_8, %c0_9, %c0_10], %17 {strides = array<i32>} : memref<1x8x8xf32, #tpu.memory_space<vmem>>, vector<1x8x8xf32>,
      %c0_11 = arith.constant 0 : index
      %c0_12 = arith.constant 0 : index
      %18 = vector.load %arg7[%c0_11, %c0_12] : memref<8x8xf32, #tpu.memory_space<vmem>>, vector<8x8xf32>
      %c0_13 = arith.constant 0 : index
      %c0_14 = arith.constant 0 : index
      %c0_15 = arith.constant 0 : index
      %19 = vector.load %arg5[%c0_13, %c0_14, %c0_15] : memref<1x8x8xf32, #tpu.memory_space<vmem>>, vector<1x8x8xf32>
      %20 = vector.shape_cast %19 : vector<1x8x8xf32> to vector<8x8xf32>
      %21 = vector.shape_cast %18 : vector<8x8xf32> to vector<1x8x8xf32>
      tpu.vector_store %arg5[%c0_13, %c0_14, %c0_15], %21 {strides = array<i32>} : memref<1x8x8xf32, #tpu.memory_space<vmem>>, vector<1x8x8xf32>,
    } else {
    }
    return
  }
  func.func @transform_0(%arg0: i32, %arg1: i32) -> (i32, i32) {
    %c1_i32 = arith.constant 1 : i32
    %0 = arith.muli %arg0, %c1_i32 : i32
    %1 = arith.addi %0, %arg1 : i32
    %c0_i32 = arith.constant 0 : i32
    %2 = arith.minsi %1, %c0_i32 : i32
    %c0_i32_0 = arith.constant 0 : i32
    %c0_i32_1 = arith.constant 0 : i32
    return %c0_i32_0, %2 : i32, i32
  }
  func.func @transform_1(%arg0: i32, %arg1: i32) -> (i32, i32) {
    %c1_i32 = arith.constant 1 : i32
    %0 = arith.muli %arg0, %c1_i32 : i32
    %1 = arith.addi %0, %arg1 : i32
    %c0_i32 = arith.constant 0 : i32
    %2 = arith.minsi %1, %c0_i32 : i32
    %c0_i32_0 = arith.constant 0 : i32
    %c0_i32_1 = arith.constant 0 : i32
    return %c0_i32_0, %2 : i32, i32
  }
  func.func @transform_2(%arg0: i32, %arg1: i32) -> (i32, i32, i32) {
    %c0_i32 = arith.constant 0 : i32
    %c0_i32_0 = arith.constant 0 : i32
    %c0_i32_1 = arith.constant 0 : i32
    return %arg0, %c0_i32, %c0_i32_0 : i32, i32, i32
  }
  func.func @transform_3(%arg0: i32, %arg1: i32) -> (i32, i32, i32) {
    %c0_i32 = arith.constant 0 : i32
    %c0_i32_0 = arith.constant 0 : i32
    %c0_i32_1 = arith.constant 0 : i32
    return %arg0, %c0_i32, %c0_i32_0 : i32, i32, i32
  }
}

</mosaic_0001>

<bundles_post_ra>
// kernel: tpu_custom_call.1
= control target key start
LH: loop header
LB: loop body
LE: loop exit
PB: predicated region body
PF: predicated region fallthrough
CT: control target
= control target key end

     0   :  { %9 = vsyncpa [#allocation5], 0  ;;  %s353_s0 = inlined_call_operand.hbm [shape: f32[8,128], index: 0, kind: input, shape index: {}]   ;;  %s354_s1 = inlined_call_operand.hbm [shape: f32[8,240], index: 1, kind: input, shape index: {}]   ;;  %s355_s2 = inlined_call_operand.hbm [shape: f32[1,8,8], index: 2, kind: output, shape index: {0}]   ;;  %s356_s3 = inlined_call_operand.hbm [shape: f32[1,8,8], index: 3, kind: output, shape index: {1}]  }
   0x1   :  { %10 = vsyncpa [#allocation8], 0 }
   0x2   :  { %11 = vsyncpa [#allocation6], 0 }
   0x3   :  { %12 = vsyncpa [#allocation11], 0  ;;  %s23_s14 = sshll.u32 %s353_s0, 4  ;;  %s310_s15 = smov [#allocation4]   ;;  %s24_s14 = int_to_ptr.hbm [resolvable:$true] %s23_s14 }
   0x4   :  { %s25_s16 = sshll.u32 %s310_s15, 4  ;;  %s40_s19 = sshll.u32 %s354_s1, 4  ;;  %s26_s16 = int_to_ptr.vmem [resolvable:$true] %s25_s16  ;;  %s41_s19 = int_to_ptr.hbm [resolvable:$true] %s40_s19 }
   0x5   :  { %28 = dma.hbm_to_vmem [thread:$0]  %s24_s14, 128, %s26_s16, [#allocation5]  }
   0x6   :  { %s311_s20 = smov [#allocation7]  }
   0x7   :  { %s42_s21 = sshll.u32 %s311_s20, 4  ;;  %s43_s21 = int_to_ptr.vmem [resolvable:$true] %s42_s21 }
   0x8   :  { %45 = dma.hbm_to_vmem [thread:$0]  %s41_s19, 256, %s43_s21, [#allocation8]  }
   0x9   :  { %302 = dma.done.wait [#allocation5], 128  }
   0xa   :  { %303 = vsyncadd [#allocation5], 4294967168 }
   0xb   :  { %304 = dma.done.wait [#allocation8], 256  }
   0xc   :  { %305 = vsyncadd [#allocation8], 4294967040  ;;  %v100_v0 = vlaneseq  ;;  %v99_v3 = vld [vmem:[#allocation7 + $0x8] sm:$0xff]  ;;  %v98_v4 = vld [vmem:[#allocation7] sm:$0xff]  ;;  %vm66_vm1 = vcmask 64512   ;;  %v312_v6 = vmov 0.0  }
   0xd   :  { %v73_v5 = vld [vmem:[#allocation4] sm:$0xff]  ;;  %126 = vmatpush.xpose.msra.mxu1 %v98_v4  ;;  %68 = vst.msk [vmem:[#allocation3] sm:$0xff] %vm66_vm1, %v312_v6  ;;  %s313_s0 = smov [#allocation9]   ;;  %s168_s24 = sshll.u32 %s355_s2, 4  ;;  %s169_s24 = int_to_ptr.hbm [resolvable:$true] %s168_s24 }
   0xe   :  { %v101_v1 = vand.u32 127, %v100_v0  ;;  %90 = vmatpush.xpose.msra.mxu0 %v73_v5  ;;  %67 = vst.msk [vmem:[#allocation2] sm:$0xff] %vm66_vm1, %v312_v6  ;;  %s166_s1 = sshll.u32 %s313_s0, 4  ;;  %s314_s25 = smov [#allocation10]   ;;  %s167_s1 = int_to_ptr.vmem [resolvable:$true] %s166_s1 }
   0xf   :  { %s177_s26 = sshll.u32 %s314_s25, 4  ;;  %s179_s29 = sshll.u32 %s356_s3, 4  ;;  %s178_s26 = int_to_ptr.vmem [resolvable:$true] %s177_s26  ;;  %s180_s29 = int_to_ptr.hbm [resolvable:$true] %s179_s29 }
  0x10   :  { %v102_v2 = vadd.s32 128, %v101_v1  ;;  %127 = vmatmul.f32.vlgmr.msra.gmra.mxu1 %v98_v4 }
  0x11   :  { %91 = vmatmul.f32.vlgmr.msra.gmra.mxu0 %v73_v5 }
  0x12   :  { %vm107_vm0 = vcmp.lt.s32.totalorder %v102_v2, 240 }
  0x13   :  { %199 = vmatpush.xpose.msk.msra.mxu2 %vm107_vm0, %v99_v3 }
  0x14   :  { %v110_v11 = vld [vmem:[#allocation3] sm:$0xff] }
  0x15   :  { %v74_v7 = vld [vmem:[#allocation2] sm:$0xff] }
  0x16   :  { %200 = vmatmul.msk.f32.vlgmr.msra.gmra.mxu2 %vm107_vm0, %v99_v3 }
  0x8d   :  { %v128_v10 = vpop.f32.mrf.mxu1 }
  0x8e   :  { %v92_v8 = vpop.f32.mrf.mxu0 }
  0x8f   :  { %v95_v9 = vadd.f32 %v92_v8, %v74_v7 }
  0x91   :  { %97 = vst.msk [vmem:[#allocation2] sm:$0xff] %vm66_vm1, %v95_v9 }
  0x98   :  { %v156_v15 = vld [vmem:[#allocation2] sm:$0xff] }
  0x99   :  { %v148_v12 = vpop.f32.mrf.mxu2  ;;  %158 = vst.msk [vmem:[#allocation9] sm:$0xff] %vm66_vm1, %v156_v15 }
  0x9a   :  { %v149_v13 = vadd.f32 %v148_v12, %v128_v10  ;;  %171 = dma.vmem_to_hbm [thread:$0]  %s167_s1, 128, %s169_s24, [#allocation6]  }
  0x9c   :  { %v151_v14 = vadd.f32 %v149_v13, %v110_v11 }
  0x9e   :  { %152 = vst.msk [vmem:[#allocation3] sm:$0xff] %vm66_vm1, %v151_v14 }
  0xa5   :  { %v159_v16 = vld [vmem:[#allocation3] sm:$0xff] }
  0xa6   :  { %160 = vst.msk [vmem:[#allocation10] sm:$0xff] %vm66_vm1, %v159_v16 }
  0xa7   :  { %182 = dma.vmem_to_hbm [thread:$0]  %s178_s26, 128, %s180_s29, [#allocation11]  }
  0xa8   :  { %306 = dma.done.wait [#allocation6], 128  }
  0xa9   :  { %307 = vsyncadd [#allocation6], 4294967168 }
  0xaa   :  { %308 = dma.done.wait [#allocation11], 128  }
  0xab   :  { %309 = vsyncadd [#allocation11], 4294967168 }
  0xac   :  { %191 = vsyncpa [#allocation5], 1 }
  0xad   :  { %192 = vsyncpa [#allocation8], 1 }
  0xae   :  { %193 = vsyncpa [#allocation6], 1 }
  0xaf   :  { %194 = vsyncpa [#allocation11], 1 }

</bundles_post_ra>
